<compile_context>
chip_gen: v7x
topology: tpu7x:2x2x1
jax: 0.10.0
libtpu: 0.0.40
codegen_flags: <defaults>
</compile_context>

<pallas_src>
import functools
import math

import jax
import jax.numpy as jnp
from jax import lax
from jax.experimental import pallas as pl
from jax.experimental.pallas import tpu as pltpu


# ----------------------------------------------------------------------------
# Generation-aware VMEM budgeting
# ----------------------------------------------------------------------------
def _vmem_limit_bytes():
    """~75% of the chip's VMEM capacity (≈96 MiB on v5e/v6e, ≈48 MiB on v7x).
    Conservative 48 MiB fallback if the query is unavailable."""
    cap = 64 * 1024 * 1024
    try:
        info = pltpu.get_tpu_info()
        q = getattr(info, "vmem_capacity_bytes", None)
        if q:
            cap = int(q)
    except Exception:
        pass
    return (cap * 3) // 4


def _pick_tile_m(m, d_in, tn, itemsize, budget):
    """Largest sublane-aligned row tile dividing M whose double-buffered x/out
    blocks plus the (double-buffered) weight block fit in `budget`."""
    weight_bytes = 2 * d_in * tn * itemsize
    per_row = 2 * itemsize * (d_in + tn)
    cap = max((budget - weight_bytes) // max(per_row, 1), 8)
    for t in (2048, 1024, 512, 256, 128, 64, 32, 16, 8):
        if t <= cap and m % t == 0:
            return t
    return m  # small / awkward M: single full-extent tile


def _pick_tile_n(d_out):
    """Column tile for the generic linear: full when modest, else a 128-multiple
    divisor so the weight block is (d_in, tn) instead of fully resident."""
    if d_out <= 1024:
        return d_out
    for t in (1024, 512, 256, 128):
        if d_out % t == 0:
            return t
    return d_out


def _pick_tile_q(seq, d_model, n_heads, itemsize, budget, masked, mask_heads):
    """Query tile for the attention grid: full S when it fits, else the largest
    8-aligned divisor whose per-step VMEM stays under budget (v7x 64 MiB)."""
    def fits(tq):
        blk = tq * d_model + 2 * seq * d_model + n_heads * tq * seq + tq * d_model
        if masked:
            blk += mask_heads * tq * seq
        vmem = 2 * itemsize * blk                      # double-buffered blocks
        vmem += 4 * n_heads * tq * seq * 3             # in-kernel f32 temporaries
        return vmem <= budget

    if fits(seq):
        return seq
    for t in (1024, 512, 256, 128, 64, 32, 16, 8):
        if seq % t == 0 and fits(t):
            return t
    return seq  # fallback (correctness first)


# ----------------------------------------------------------------------------
# Projection kernels:  out = x @ w + b
# ----------------------------------------------------------------------------
def _matmul_bias_kernel(x_ref, w_ref, b_ref, o_ref):
    acc = jnp.dot(x_ref[...], w_ref[...], preferred_element_type=jnp.float32)
    o_ref[...] = (acc + b_ref[...].astype(jnp.float32)).astype(o_ref.dtype)


def _qkv_projection(x2d, w3, b3, out_dtype, vmem_limit):
    """x2d (M, D) @ stacked (3, D, D) weights -> (3, M, D). The p-axis is the
    outer grid axis so each projection's weight stays resident across the row
    sweep (Pallas skips re-fetch on an unchanged block index)."""
    m, d = x2d.shape
    itemsize = jnp.dtype(out_dtype).itemsize
    budget = vmem_limit - (4 << 20)
    tm = _pick_tile_m(m, d, d, itemsize, budget)
    return pl.pallas_call(
        _matmul_bias_kernel,
        out_shape=jax.ShapeDtypeStruct((3, m, d), out_dtype),
        grid=(3, m // tm),
        in_specs=[
            pl.BlockSpec((tm, d), lambda p, i: (i, 0)),
            pl.BlockSpec((None, d, d), lambda p, i: (p, 0, 0)),
            pl.BlockSpec((None, 1, d), lambda p, i: (p, 0, 0)),
        ],
        out_specs=pl.BlockSpec((None, tm, d), lambda p, i: (p, i, 0)),
        compiler_params=pltpu.CompilerParams(
            dimension_semantics=("parallel", "parallel"),
            vmem_limit_bytes=vmem_limit),
    )(x2d, w3, b3)


def _linear(x2d, w, b2d, out_dtype, vmem_limit):
    """Generic row/col-tiled linear used for the output projection."""
    m, d_in = x2d.shape
    d_out = w.shape[-1]
    itemsize = jnp.dtype(out_dtype).itemsize
    budget = vmem_limit - (4 << 20)
    tn = _pick_tile_n(d_out)
    tm = _pick_tile_m(m, d_in, tn, itemsize, budget)
    return pl.pallas_call(
        _matmul_bias_kernel,
        out_shape=jax.ShapeDtypeStruct((m, d_out), out_dtype),
        grid=(d_out // tn, m // tm),       # col-block outer -> weight resident
        in_specs=[
            pl.BlockSpec((tm, d_in), lambda j, i: (i, 0)),
            pl.BlockSpec((d_in, tn), lambda j, i: (0, j)),
            pl.BlockSpec((1, tn), lambda j, i: (0, j)),
        ],
        out_specs=pl.BlockSpec((tm, tn), lambda j, i: (i, j)),
        compiler_params=pltpu.CompilerParams(
            dimension_semantics=("parallel", "parallel"),
            vmem_limit_bytes=vmem_limit),
    )(x2d, w, b2d)


# ----------------------------------------------------------------------------
# Attention kernel: all heads of one batch / one q-tile per grid step
# ----------------------------------------------------------------------------
def _attn_body(q_ref, k_ref, v_ref, m_ref, w_ref, c_ref, *, n_heads, scale,
               mask_heads):
    # q_ref (tq, D); k_ref/v_ref (S, D); m_ref (mh, tq, S) or None
    # w_ref (H, tq, S); c_ref (tq, D)
    q = q_ref[...] * scale          # fold 1/sqrt(hd) into Q (tq*D mults, not tq*S)
    k = k_ref[...]
    v = v_ref[...]
    hd = q.shape[-1] // n_heads
    ctx_parts = []
    for h in range(n_heads):        # static unroll; head slices are lane slices
        qh = q[:, h * hd:(h + 1) * hd]
        kh = k[:, h * hd:(h + 1) * hd]
        vh = v[:, h * hd:(h + 1) * hd]
        # native-dtype operands (bf16-friendly), f32 MXU accumulation
        s = lax.dot_general(qh, kh, (((1,), (1,)), ((), ())),
                            preferred_element_type=jnp.float32)      # (tq, S)
        if m_ref is not None:
            mrow = m_ref[h] if mask_heads == n_heads else m_ref[0]   # (tq, S)
            s = jnp.where(mrow == 0, jnp.float32(-1e9), s)
        s_max = jnp.max(s, axis=-1, keepdims=True)
        p = jnp.exp(s - s_max)
        inv = pl.reciprocal(jnp.sum(p, axis=-1, keepdims=True), approx=True)
        attn = p * inv
        # TODO(synk): training-mode dropout(attn) skipped — eval-mode identity.
        w_ref[h] = attn.astype(w_ref.dtype)
        ctx_parts.append(
            jnp.dot(attn.astype(v.dtype), vh, preferred_element_type=jnp.float32))
    c_ref[...] = jnp.concatenate(ctx_parts, axis=-1).astype(c_ref.dtype)


def _attn_kernel(q_ref, k_ref, v_ref, w_ref, c_ref, *, n_heads, scale):
    _attn_body(q_ref, k_ref, v_ref, None, w_ref, c_ref,
               n_heads=n_heads, scale=scale, mask_heads=0)


def _attn_kernel_masked(q_ref, k_ref, v_ref, m_ref, w_ref, c_ref, *, n_heads,
                        scale, mask_heads):
    _attn_body(q_ref, k_ref, v_ref, m_ref, w_ref, c_ref,
               n_heads=n_heads, scale=scale, mask_heads=mask_heads)


def _attention(qkv3, n_heads, mask, batch, seq, d_model, out_dtype, vmem_limit):
    hd = d_model // n_heads
    scale = 1.0 / math.sqrt(hd)
    itemsize = jnp.dtype(out_dtype).itemsize

    masked = mask is not None
    if masked:
        m = jnp.asarray(mask)
        while m.ndim < 4:
            m = m[None]
        mb, mh = int(m.shape[0]), int(m.shape[1])
        assert mb in (1, batch) and mh in (1, n_heads), "unsupported mask shape"
        if m.shape[2] != seq or m.shape[3] != seq:
            m = jnp.broadcast_to(m, (mb, mh, seq, seq))
    else:
        mb = mh = 1

    budget = vmem_limit - (4 << 20)
    tq = _pick_tile_q(seq, d_model, n_heads, itemsize, budget, masked, mh)
    grid = (batch, seq // tq)

    q_spec = pl.BlockSpec((None, None, tq, d_model), lambda b, qi: (0, b, qi, 0))
    k_spec = pl.BlockSpec((None, None, seq, d_model), lambda b, qi: (1, b, 0, 0))
    v_spec = pl.BlockSpec((None, None, seq, d_model), lambda b, qi: (2, b, 0, 0))
    w_spec = pl.BlockSpec((None, n_heads, tq, seq), lambda b, qi: (b, 0, qi, 0))
    c_spec = pl.BlockSpec((None, tq, d_model), lambda b, qi: (b, qi, 0))

    out_shapes = (jax.ShapeDtypeStruct((batch, n_heads, seq, seq), out_dtype),
                  jax.ShapeDtypeStruct((batch, seq, d_model), out_dtype))
    cparams = pltpu.CompilerParams(
        dimension_semantics=("parallel", "parallel"),
        vmem_limit_bytes=vmem_limit)

    if not masked:
        return pl.pallas_call(
            functools.partial(_attn_kernel, n_heads=n_heads, scale=scale),
            out_shape=out_shapes,
            grid=grid,
            in_specs=[q_spec, k_spec, v_spec],
            out_specs=(w_spec, c_spec),
            compiler_params=cparams,
        )(qkv3, qkv3, qkv3)

    m_spec = pl.BlockSpec(
        (None, mh, tq, seq),
        lambda b, qi: ((b if mb == batch else 0), 0, qi, 0))
    return pl.pallas_call(
        functools.partial(_attn_kernel_masked, n_heads=n_heads, scale=scale,
                          mask_heads=mh),
        out_shape=out_shapes,
        grid=grid,
        in_specs=[q_spec, k_spec, v_spec, m_spec],
        out_specs=(w_spec, c_spec),
        compiler_params=cparams,
    )(qkv3, qkv3, qkv3, m)


# ----------------------------------------------------------------------------
# Full MultiHeadAttention forward
# ----------------------------------------------------------------------------
def prepare_params(params):
    """One-time weight preprocessing (hoist out of the per-call forward path):
    stack transposed Q/K/V weights to (3, D, D) + biases (3, 1, D), and
    pre-transpose W_o to (in, out)."""
    w_q, b_q, w_k, b_k, w_v, b_v, w_o, b_o = params
    d = w_q.shape[0]
    w_qkv = jnp.stack([w_q.T, w_k.T, w_v.T])              # (3, D, D)
    b_qkv = jnp.stack([b_q, b_k, b_v]).reshape(3, 1, d)   # (3, 1, D)
    return (w_qkv, b_qkv, w_o.T, b_o.reshape(1, d))


def multi_head_attention_prepared(x, prepared, n_heads, mask=None):
    """x: (B, S, D). prepared = prepare_params(raw_params)."""
    w_qkv, b_qkv, w_o_t, b_o = prepared
    B, S, D = x.shape
    M = B * S
    dtype = x.dtype
    vmem_limit = _vmem_limit_bytes()

    # 1) fused QKV projection -> (3, M, D); reshape to (3, B, S, D) is free,
    #    so there is no XLA split/transpose round-trip before attention.
    qkv = _qkv_projection(x.reshape(M, D), w_qkv, b_qkv, dtype, vmem_limit)
    qkv = qkv.reshape(3, B, S, D)

    # 2) attention over a (batch, q-tile) grid; ctx emitted in (B, S, D) layout.
    attn_w, ctx = _attention(qkv, n_heads, mask, B, S, D, dtype, vmem_limit)

    # 3) output projection; merge-heads is a free reshape.
    out = _linear(ctx.reshape(M, D), w_o_t, b_o, dtype, vmem_limit)
    return out.reshape(B, S, D), attn_w


def multi_head_attention(x, params, n_heads, mask=None):
    """Convenience wrapper taking raw PyTorch-layout params (re-fuses weights
    every call; prefer prepare_params + multi_head_attention_prepared)."""
    return multi_head_attention_prepared(x, prepare_params(params), n_heads, mask)


# ----------------------------------------------------------------------------
# Pure-JAX reference (mirrors the PyTorch module, eval-mode dropout)
# ----------------------------------------------------------------------------
def _reference_mha(x, params, n_heads, mask):
    w_q, b_q, w_k, b_k, w_v, b_v, w_o, b_o = params
    B, S, D = x.shape
    hd = D // n_heads
    hp = jax.lax.Precision.HIGHEST

    def proj(w, b):
        y = jnp.einsum("bsd,ed->bse", x, w, precision=hp) + b
        return y.reshape(B, S, n_heads, hd).transpose(0, 2, 1, 3)

    q, k, v = proj(w_q, b_q), proj(w_k, b_k), proj(w_v, b_v)
    scores = jnp.einsum("bhqd,bhkd->bhqk", q, k, precision=hp) / math.sqrt(hd)
    if mask is not None:
        scores = jnp.where(mask == 0, -1e9, scores)
    attn = jax.nn.softmax(scores, axis=-1)
    ctx = jnp.einsum("bhqk,bhkd->bhqd", attn, v, precision=hp)
    ctx = ctx.transpose(0, 2, 1, 3).reshape(B, S, D)
    out = jnp.einsum("bsd,ed->bse", ctx, w_o, precision=hp) + b_o
    return out, attn


if __name__ == "__main__":
    batch, seq, d_model, n_heads = 2, 8, 32, 4

    key = jax.random.PRNGKey(0)
    keys = jax.random.split(key, 9)
    x = jax.random.normal(keys[0], (batch, seq, d_model), dtype=jnp.float32)

    def init_w(k):
        return jax.random.normal(k, (d_model, d_model), dtype=jnp.float32) * 0.1

    def init_b(k):
        return jax.random.normal(k, (d_model,), dtype=jnp.float32) * 0.1

    w_q, w_k, w_v, w_o = (init_w(keys[i]) for i in (1, 2, 3, 4))
    b_q, b_k, b_v, b_o = (init_b(keys[i]) for i in (5, 6, 7, 8))
    params = (w_q, b_q, w_k, b_k, w_v, b_v, w_o, b_o)
    prepared = prepare_params(params)   # weight preprocessing hoisted (once)

    causal = jnp.tril(jnp.ones((seq, seq), jnp.float32)).reshape(1, 1, seq, seq)

    out_nm, attn_nm = multi_head_attention_prepared(x, prepared, n_heads, mask=None)
    out_m, attn_m = multi_head_attention_prepared(x, prepared, n_heads, mask=causal)
    jax.block_until_ready((out_nm, attn_nm, out_m, attn_m))

    ref_out_nm, ref_attn_nm = _reference_mha(x, params, n_heads, None)
    ref_out_m, ref_attn_m = _reference_mha(x, params, n_heads, causal)

    assert out_nm.shape == (batch, seq, d_model)
    assert attn_nm.shape == (batch, n_heads, seq, seq)
    # Tolerance covers MXU multi-pass f32 rounding plus the EUP approximate
    # reciprocal used for the softmax normalization.
    for got, want in ((out_nm, ref_out_nm), (attn_nm, ref_attn_nm),
                      (out_m, ref_out_m), (attn_m, ref_attn_m)):
        assert jnp.allclose(got, want, atol=2e-3, rtol=2e-3), (
            float(jnp.max(jnp.abs(got - want))))

    print("KERNEL_OK")
</pallas_src>

<mosaic_0001>
module attributes {stable_mosaic.version = 11 : i64} {
  func.func @_matmul_bias_kernel(%arg0: i32, %arg1: i32, %arg2: memref<16x32xf32, #tpu.memory_space<vmem>>, %arg3: memref<1x32x32xf32, #tpu.memory_space<vmem>>, %arg4: memref<1x1x32xf32, #tpu.memory_space<vmem>>, %arg5: memref<1x16x32xf32, #tpu.memory_space<vmem>>) attributes {dimension_semantics = [#tpu.dimension_semantics<parallel>, #tpu.dimension_semantics<parallel>], iteration_bounds = array<i64: 3, 1>, scalar_prefetch = 0 : i64, scratch_operands = 0 : i64, tpu.core_type = #tpu.core_type<tc>, window_params = [{transform_indices = @transform_0, window_bounds = array<i64: 16, 32>}, {transform_indices = @transform_1, window_bounds = array<i64: 1, 32, 32>}, {transform_indices = @transform_2, window_bounds = array<i64: 1, 1, 32>}, {transform_indices = @transform_3, window_bounds = array<i64: 1, 16, 32>}]} {
    %c0 = arith.constant 0 : index
    %c0_0 = arith.constant 0 : index
    %0 = vector.load %arg2[%c0, %c0_0] : memref<16x32xf32, #tpu.memory_space<vmem>>, vector<16x32xf32>
    %c0_1 = arith.constant 0 : index
    %c0_2 = arith.constant 0 : index
    %c0_3 = arith.constant 0 : index
    %1 = vector.load %arg3[%c0_1, %c0_2, %c0_3] : memref<1x32x32xf32, #tpu.memory_space<vmem>>, vector<1x32x32xf32>
    %2 = vector.shape_cast %1 : vector<1x32x32xf32> to vector<32x32xf32>
    %cst = arith.constant dense<0.000000e+00> : vector<16x32xf32>
    %3 = tpu.matmul %0, %2, %cst {dimension_numbers = #tpu.dot_dimension_numbers<[1], [0], [0], [1], [0, 0, 1, 1], [], []>} : vector<16x32xf32>, vector<32x32xf32>, vector<16x32xf32> -> vector<16x32xf32>
    %c0_4 = arith.constant 0 : index
    %c0_5 = arith.constant 0 : index
    %c0_6 = arith.constant 0 : index
    %4 = vector.load %arg4[%c0_4, %c0_5, %c0_6] : memref<1x1x32xf32, #tpu.memory_space<vmem>>, vector<1x1x32xf32>
    %5 = vector.shape_cast %4 : vector<1x1x32xf32> to vector<1x32xf32>
    %6 = vector.broadcast %5 : vector<1x32xf32> to vector<16x32xf32>
    %7 = arith.addf %3, %6 : vector<16x32xf32>
    %c0_7 = arith.constant 0 : index
    %c0_8 = arith.constant 0 : index
    %c0_9 = arith.constant 0 : index
    %8 = vector.load %arg5[%c0_7, %c0_8, %c0_9] : memref<1x16x32xf32, #tpu.memory_space<vmem>>, vector<1x16x32xf32>
    %9 = vector.shape_cast %8 : vector<1x16x32xf32> to vector<16x32xf32>
    %10 = vector.shape_cast %7 : vector<16x32xf32> to vector<1x16x32xf32>
    tpu.vector_store %arg5[%c0_7, %c0_8, %c0_9], %10 {strides = array<i32>} : memref<1x16x32xf32, #tpu.memory_space<vmem>>, vector<1x16x32xf32>,
    return
  }
  func.func @transform_0(%arg0: i32, %arg1: i32) -> (i32, i32) {
    %c0_i32 = arith.constant 0 : i32
    %c0_i32_0 = arith.constant 0 : i32
    return %arg1, %c0_i32 : i32, i32
  }
  func.func @transform_1(%arg0: i32, %arg1: i32) -> (i32, i32, i32) {
    %c0_i32 = arith.constant 0 : i32
    %c0_i32_0 = arith.constant 0 : i32
    %c0_i32_1 = arith.constant 0 : i32
    return %arg0, %c0_i32, %c0_i32_0 : i32, i32, i32
  }
  func.func @transform_2(%arg0: i32, %arg1: i32) -> (i32, i32, i32) {
    %c0_i32 = arith.constant 0 : i32
    %c0_i32_0 = arith.constant 0 : i32
    %c0_i32_1 = arith.constant 0 : i32
    return %arg0, %c0_i32, %c0_i32_0 : i32, i32, i32
  }
  func.func @transform_3(%arg0: i32, %arg1: i32) -> (i32, i32, i32) {
    %c0_i32 = arith.constant 0 : i32
    %c0_i32_0 = arith.constant 0 : i32
    return %arg0, %arg1, %c0_i32 : i32, i32, i32
  }
}

</mosaic_0001>

<bundles_post_ra>
// kernel: tpu_custom_call.1
= control target key start
LH: loop header
LB: loop body
LE: loop exit
PB: predicated region body
PF: predicated region fallthrough
CT: control target
= control target key end

     0   :  { %8 = vsyncpa [#allocation3], 0  ;;  %s992_s0 = inlined_call_operand.hbm [shape: f32[16,32], index: 0, kind: input, shape index: {}]   ;;  %s993_s1 = inlined_call_operand.hbm [shape: f32[3,32,32], index: 1, kind: input, shape index: {}]   ;;  %s994_s2 = inlined_call_operand.vmem [shape: f32[3,1,32], index: 2, kind: input, shape index: {}]   ;;  %s995_s3 = inlined_call_operand.hbm [shape: f32[3,16,32], index: 3, kind: output, shape index: {}]  }
   0x1   :  { %9 = vsyncpa [#allocation6], 0 }
   0x2   :  { %11 = vsyncpa [#allocation6 + $0x1], 0 }
   0x3   :  { %12 = vsyncpa [#allocation4], 0 }
   0x4   :  { %14 = vsyncpa [#allocation4 + $0x1], 0  ;;  %s759_s12 = smov 0   ;;  %s761_s13 = smov 0  }
   0x5   :  { %s763_s14 = smov 0   ;;  %s765_s15 = smov 0  }
   0x6   :  { %s767_s16 = smov 0   ;;  %s769_s17 = smov 0  }
   0x7 LB: > { %s462_s18 = sadd.s32 4294967295, %s730_s17   ;;  %s463_s19 = sadd.s32 4294967294, %s730_s17   ;;  %s730_s17 = sphi %s769_s17, %s20_s17   ;;  %s726_s16 = sphi %s767_s16, %s1018_s16   ;;  %s722_s15 = sphi %s765_s15, %s1017_s15   ;;  %s718_s14 = sphi %s763_s14, %s1016_s14   ;;  %s714_s13 = sphi %s761_s13, %s1015_s13   ;;  %s710_s12 = sphi %s759_s12, %s1014_s12  }
   0x8   : > { %p78_p0 = scmp.ne.s32.totalorder %s714_s13, %s710_s12  ;;  %p793_p1 = scmp.eq.s32.totalorder %s462_s18, 0 }
   0x9   : > { %p797_p2 = scmp.eq.s32.totalorder %s462_s18, 2  ;;  %p136_p3 = scmp.eq.s32.totalorder %s463_s19, 2 }
   0xa   : > { %s1000_s20 = scalar_select %p793_p1, 1, 0 }
   0xb   : > { %s1001_s21 = scalar_select %p797_p2, 1, 0 }
   0xc   : > { %p803_p4 = por %p793_p1, %p78_p0  ;;  %p464_p5 = scmp.ge.s32.totalorder %s730_s17, 1 }
   0xd   : > { %p808_p6 = por %p136_p3, %p78_p0  ;;  %p143_p7 = scmp.lt.s32.totalorder %s730_s17, 4 }
   0xe   : > { %s1002_s22 = scalar_select %p803_p4, 1, 0 }
   0xf   : > { %s1003_s23 = scalar_select %p808_p6, 1, 0 }
  0x10   : > { %p813_p8 = pnand %p464_p5, %p143_p7  ;;  %s732_s25 = smov [#allocation2]  }
  0x11   : > { %s158_s26 = sshll.u32 %s732_s25, 4  ;;  %s32_s28 = sadd.s32 1, %s726_s16  ;;  %s159_s26 = int_to_ptr.vmem [resolvable:$true] %s158_s26 }
  0x12   : > { %s1004_s24 = scalar_select %p813_p8, 1, 0 }
  0x13   : > { %p517_p9 = pneg %p813_p8  ;;  %s586_s4 = scalar_lea.hbm %s992_s0, 256 }
  0x14   : > { %p587_p11 = scmp.ne.s32.totalorder %s992_s0, %s586_s4  ;;  %p593_p3 = scmp.lt.u32.totalorder %s586_s4, %s992_s0 }
  0x15   : > { %p821_p10 = pnand %p517_p9, %p793_p1 }
  0x17   : > { %p588_p12 = pneg %p821_p10 }
  0x19   : > { %p589_p13 = pnand %p588_p12, %p587_p11 }
  0x1b   : > { %p590_p0 = pneg %p589_p13 }
  0x1d   : > { %p595_p5 = pnand %p593_p3, %p590_p0 }
  0x1f   : > { %598 = shalt.err (!%p595_p5)
}
  0x20   : > { %s599_s9 = scalar_lea.vmem %s159_s26, 256  ;;  %p607_p4 = scmp.lt.s32.totalorder %s159_s26, %s159_s26 }
  0x21   : > { %p600_p7 = scmp.ne.s32.totalorder %s159_s26, %s599_s9  ;;  %p608_p1 = scmp.lt.s32.totalorder %s599_s9, %s599_s9 }
  0x23   : > { %p602_p9 = pnand %p600_p7, %p588_p12  ;;  %p609_p8 = por %p608_p1, %p607_p4 }
  0x25   : > { %p603_p6 = pneg %p602_p9 }
  0x27   : > { %p610_p2 = pnand %p609_p8, %p603_p6 }
  0x29   : > { %613 = shalt.err (!%p610_p2)
}
  0x2a   : > { %s733_s10 = smov 128   ;;  %s734_s11 = smov 8  }
  0x2b   : > { %520 = dma.hbm_to_vmem [thread:$0]  (!%p821_p10), %s992_s0, 256, %s159_s26, [#allocation3], %s733_s10, %s733_s10, %s734_s11  }
  0x2c   : > { %p34_p1 = scmp.ge.s32.totalorder %s32_s28, 3  ;;  %s65_s25 = sadd.s32 1, %s718_s14 }
  0x2d   : > { %p72_p2 = scmp.ne.s32.totalorder %s718_s14, %s714_s13  ;;  %p73_p4 = scmp.eq.s32.totalorder %s730_s17, 0 }
  0x2e   : > { %s1020_s28 = smov (%p34_p1, %s32_s28), 0  ;;  %p1007_p8 = scmp.ne.s32.totalorder %s1001_s21, 0 }
  0x2f   : > { %p851_p6 = por %p73_p4, %p72_p2  ;;  %s62_s30 = ssub.s32 %s726_s16, %s1020_s28 }
  0x30   : > { %p857_p11 = por %p1007_p8, %p72_p2  ;;  %p530_p12 = scmp.lt.s32.totalorder %s730_s17, 3 }
  0x31   : > { %p63_p10 = scmp.eq.s32.totalorder %s62_s30, 0  ;;  %s172_s26 = sand.u32 1, %s718_s14  }
  0x32   : > { %s467_s4 = sshll.u32 %s172_s26, 5  ;;  %s482_s6 = sshll.u32 %s726_s16, 9 }
  0x33   : > { %s866_s5 = scalar_select %p63_p10, %s718_s14, %s65_s25  }
  0x34   : > { %s872_s9 = scalar_lea.hbm %s993_s1, %s482_s6  ;;  %s176_s21 = scalar_lea.vmem [#allocation5], %s467_s4 }
  0x35   : > { %s183_s18 = sshll.u32 %s176_s21, 4  ;;  %p878_p13 = pnand %p530_p12, %p851_p6  ;;  %s874_s18 = int_to_ptr.vmem [resolvable:$true] %s183_s18 }
  0x36   : > { %s882_s25 = scalar_lea.sflag [#allocation6], %s172_s26  ;;  %s614_s30 = scalar_lea.hbm %s872_s9, 512 }
  0x37   : > { %p615_p0 = scmp.ne.s32.totalorder %s872_s9, %s614_s30  ;;  %p616_p3 = pneg %p878_p13 }
  0x38   : > { %s619_s29 = scalar_lea.hbm %s993_s1, 1536  ;;  %p620_p9 = scmp.lt.u32.totalorder %s872_s9, %s993_s1 }
  0x39   : > { %p617_p5 = pnand %p616_p3, %p615_p0  ;;  %p621_p1 = scmp.lt.u32.totalorder %s619_s29, %s614_s30 }
  0x3a   : > { %p623_p4 = scmp.lt.u32.totalorder %s614_s30, %s872_s9 }
  0x3b   : > { %p618_p7 = pneg %p617_p5  ;;  %p622_p2 = por %p621_p1, %p620_p9 }
  0x3d   : > { %p624_p6 = por %p623_p4, %p622_p2 }
  0x3f   : > { %p625_p8 = pnand %p624_p6, %p618_p7 }
  0x41   : > { %628 = shalt.err (!%p625_p8)
}
  0x42   : > { %s629_s26 = scalar_lea.vmem %s874_s18, 512  ;;  %s735_s21 = smov [#allocation5]  }
  0x43   : > { %p630_p12 = scmp.ne.s32.totalorder %s874_s18, %s629_s26  ;;  %s634_s4 = sshll.u32 %s735_s21, 4  ;;  %s635_s4 = int_to_ptr.vmem [resolvable:$false] %s634_s4 }
  0x44   : > { %s636_s6 = scalar_lea.vmem %s635_s4, 1024  ;;  %p637_p5 = scmp.lt.s32.totalorder %s874_s18, %s635_s4 }
  0x45   : > { %p632_p10 = pnand %p630_p12, %p616_p3  ;;  %p638_p9 = scmp.lt.s32.totalorder %s636_s6, %s629_s26 }
  0x47   : > { %p633_p0 = pneg %p632_p10  ;;  %p639_p1 = por %p638_p9, %p637_p5 }
  0x49   : > { %p640_p2 = pnand %p639_p1, %p633_p0 }
  0x4b   : > { %643 = shalt.err (!%p640_p2)
}
  0x4c   : > { %524 = dma.hbm_to_vmem [thread:$0]  (!%p878_p13), %s872_s9, 512, %s874_s18, %s882_s25, %s733_s10, %s733_s10, %s734_s11  }
  0x4d   : > { %p1010_p3 = scmp.ne.s32.totalorder %s1004_s24, 0 }
  0x4e   : > { %p1011_p7 = scmp.ne.s32.totalorder (!%p1010_p3), %s1000_s20, 0 }
  0x4f   : > { %201 = sbr.rel (%p1010_p3) target bundleno = 332 (0x14c), region = 32 }
  0x56   : > { %697 = dma.done.wait (%p1011_p7), [#allocation3], 256  }
  0x57   : > { %699 = vsyncadd (%p1011_p7), [#allocation3], 4294967040  ;;  %s920_s30 = sand.u32 1, %s714_s13   ;;  %p1012_p4 = scmp.ne.s32.totalorder %s1002_s22, 0 }
  0x58   : > { %s472_s19 = sshll.u32 %s920_s30, 5  ;;  %s208_s29 = scalar_lea.sflag [#allocation6], %s920_s30 }
  0x59   : > { %s211_s7 = scalar_lea.vmem [#allocation5], %s472_s19 }
  0x5a   : > { %701 = dma.done.wait (%p1012_p4), %s208_s29, 512  }
  0x5b   : > { %703 = vsyncadd (%p1012_p4), %s208_s29, 4294966784  ;;  %vm255_vm0 = vcmask 261120   ;;  %v244_v0 = vld [vmem:[%s211_s7] sm:$0xff]  ;;  %v245_v1 = vld [vmem:[%s211_s7 + $0x8] sm:$0xff]  ;;  %p238_p13 = scmp.lt.s32.totalorder %s722_s15, 2  ;;  %s473_s20 = sshll.u32 %s920_s30, 4 }
  0x5c   : > { %v246_v2 = vld [vmem:[%s211_s7 + $0x10] sm:$0xff]  ;;  %v501_v3 = vpack.c.bf16 %v245_v1, %v244_v0  ;;  %v247_v4 = vld [vmem:[%s211_s7 + $0x18] sm:$0xff]  ;;  %s236_s9 = scalar_lea.vmem [#allocation7], %s473_s20  ;;  %s483_s25 = sshll.u32 %s722_s15, 8 }
  0x5d   : > { %v242_v5 = vld [vmem:[#allocation2] sm:$0xff]  ;;  %v505_v6 = vpack.c.bf16 %v247_v4, %v246_v2  ;;  %v243_v7 = vld [vmem:[#allocation2 + $0x8] sm:$0xff]  ;;  %s239_s22 = scalar_select %p238_p13, %s722_s15, 2 }
  0x5e   : > { %498 = vmatprep.mubr.msk.f32.mxu0 %vm255_vm0, %v242_v5  ;;  %502 = vmatprep.subr.bf16.mxu0 %v501_v3  ;;  %s355_s18 = sshll.u32 %s236_s9, 4  ;;  %s942_s21 = scalar_lea.hbm %s995_s3, %s483_s25  ;;  %s937_s18 = int_to_ptr.vmem [resolvable:$true] %s355_s18 }
  0x5f   : > { %504 = vmatpush3.bf16.msra.mxu0 %v501_v3  ;;  %s240_s11 = scalar_lea.vmem %s994_s2, %s239_s22  ;;  %s340_s4 = scalar_lea.sflag [#allocation4], %s920_s30 }
  0x60   : > { %506 = vmatprep.subr.bf16.mxu0 %v505_v6  ;;  %v474_v8 = vld [vmem:[%s240_s11] ss:$0 sm:$0xff]  ;;  %s644_s15 = scalar_lea.vmem %s937_s18, 256  ;;  %s736_s6 = smov [#allocation7]  }
  0x61   : > { %p645_p6 = scmp.ne.s32.totalorder %s937_s18, %s644_s15  ;;  %s648_s19 = sshll.u32 %s736_s6, 4  ;;  %s649_s19 = int_to_ptr.vmem [resolvable:$false] %s648_s19 }
  0x62   : > { %s650_s29 = scalar_lea.vmem %s649_s19, 512  ;;  %p651_p10 = scmp.lt.s32.totalorder %s937_s18, %s649_s19 }
  0x63   : > { %508 = vmatpush3.bf16.msra.mxu0 %v505_v6  ;;  %p646_p8 = pnand %p645_p6, %p857_p11  ;;  %p652_p0 = scmp.lt.s32.totalorder %s650_s29, %s644_s15 }
  0x65   : > { %p647_p12 = pneg %p646_p8  ;;  %p653_p5 = por %p652_p0, %p651_p10 }
  0x66   : > { %499 = vmatmul.mubr.msk.f32.vlgmr.msra.gmra.mrb[0].mxu0 %vm255_vm0, %v243_v7 }
  0x67   : > { %p654_p9 = pnand %p653_p5, %p647_p12 }
 0x139   : > { %v500_v9 = vpop.f32.mrb[0].mxu0 }
 0x13a   : > { %v334_v10 = vadd.f32 %v500_v9, %v474_v8  ;;  %v328_v11 = vpop.f32.mrb[1].mxu0 }
 0x13b   : > { %v329_v12 = vadd.f32 %v474_v8, %v328_v11 }
 0x13c   : > { %338 = vst.msk [vmem:[%s236_s9 + $0x8] sm:$0xff] %vm255_vm0, %v334_v10 }
 0x13d   : > { %337 = vst.msk [vmem:[%s236_s9] sm:$0xff] %vm255_vm0, %v329_v12 }
 0x13e   : > { %657 = shalt.err (!%p654_p9)
}
 0x13f   : > { %s658_s7 = scalar_lea.hbm %s942_s21, 256  ;;  %s662_s24 = scalar_lea.hbm %s995_s3, 768 }
 0x140   : > { %p659_p1 = scmp.ne.s32.totalorder %s942_s21, %s658_s7  ;;  %p663_p7 = scmp.lt.u32.totalorder %s942_s21, %s995_s3 }
 0x141   : > { %p664_p4 = scmp.lt.u32.totalorder %s662_s24, %s658_s7  ;;  %p666_p6 = scmp.lt.u32.totalorder %s658_s7, %s942_s21 }
 0x142   : > { %p660_p2 = pnand %p659_p1, %p857_p11 }
 0x143   : > { %p665_p13 = por %p664_p4, %p663_p7 }
 0x144   : > { %p661_p3 = pneg %p660_p2 }
 0x145   : > { %p667_p8 = por %p666_p6, %p665_p13 }
 0x147   : > { %p668_p12 = pnand %p667_p8, %p661_p3 }
 0x149   : > { %671 = shalt.err (!%p668_p12)
}
 0x14a   : > { %s737_s9 = smov 128   ;;  %s738_s25 = smov 8  }
 0x14b   : > { %515 = dma.vmem_to_hbm [thread:$0]  (%p857_p11), %s937_s18, 256, %s942_s21, %s340_s4, %s737_s9, %s737_s9, %s738_s25  }
 0x14c PF: > { %p532_p10 = scmp.ge.s32.totalorder %s730_s17, 2  ;;  %s370_s8 = sand.u32 1, %s710_s12  }
 0x14d   : > { %p1013_p0 = scmp.ne.s32.totalorder %s1003_s23, 0  ;;  %s371_s26 = scalar_lea.sflag [#allocation4], %s370_s8 }
 0x14f   : > { %p526_p5 = pnand %p532_p10, %p1013_p0 }
 0x151   : > { %705 = dma.done.wait (!%p526_p5), %s371_s26, 256  }
 0x152   : > { %707 = vsyncadd (!%p526_p5), %s371_s26, 4294967040  ;;  %s20_s17 = sadd.s32 1, %s730_s17   ;;  %s1014_s12 = smov %s714_s13 }
 0x153   : > { %p17_p9 = scmp.ge.s32.totalorder %s20_s17, 5   ;;  %s1015_s13 = smov %s718_s14 }
 0x154   : > { %s1016_s14 = smov %s866_s5  ;;  %s1017_s15 = smov %s726_s16 }
 0x155   : > { %s1018_s16 = smov %s1020_s28  ;;  %19 = sbr.rel (!%p17_p9) target bundleno = 7 (0x7), region = 86 }
 0x15c   :  { %376 = vsyncpa [#allocation3], 1 }
 0x15d   :  { %378 = vsyncpa [#allocation3 + $0x1], 1 }
 0x15e   :  { %379 = vsyncpa [#allocation6], 1 }
 0x15f   :  { %381 = vsyncpa [#allocation6 + $0x1], 1 }
 0x160   :  { %382 = vsyncpa [#allocation4], 1 }
 0x161   :  { %384 = vsyncpa [#allocation4 + $0x1], 1 }

</bundles_post_ra>
